<compile_context>
chip_gen: v5e
topology: v5e:2x2
jax: 0.10.0
libtpu: 0.0.40
codegen_flags: <defaults>
</compile_context>

<pallas_src>
import functools

import jax
import jax.numpy as jnp
from jax.experimental import pallas as pl
from jax.experimental.pallas import tpu as pltpu


def _mwce_kernel(pred_ref, tgt_ref, msk_ref, out_ref, *,
                 hw, tl, inmask_weight, outmask_weight):
    j = pl.program_id(1)

    @pl.when(j == 0)
    def _():
        out_ref[...] = jnp.zeros_like(out_ref)

    lg = pred_ref[0].astype(jnp.float32)         # (C, TL)  classes x pixels
    tgt = tgt_ref[0]                             # (1, TL)  int32
    msk = msk_ref[0]                             # (1, TL)  int32

    # ragged last tile: pixels with global index >= H*W contribute nothing
    pix = j * tl + jax.lax.broadcasted_iota(jnp.int32, (1, tl), 1)
    valid = pix < hw                             # (1, TL) bool
    lg = jnp.where(valid, lg, 0.0)               # also scrubs OOB garbage

    # stable log-sum-exp over the class (sublane) axis
    m = jnp.max(lg, axis=0, keepdims=True)                            # (1, TL)
    lse = m + jnp.log(jnp.sum(jnp.exp(lg - m), axis=0, keepdims=True))

    # logit at the target class via one-hot compare (no per-pixel gather)
    cls = jax.lax.broadcasted_iota(jnp.int32, lg.shape, 0)             # (C, TL)
    tgt_logit = jnp.sum(jnp.where(cls == tgt, lg, 0.0),
                        axis=0, keepdims=True)                         # (1, TL)

    ce = lse - tgt_logit                                               # (1, TL)
    w = jnp.where(msk != 0, jnp.float32(inmask_weight),
                  jnp.float32(outmask_weight))
    w = jnp.where(valid, w, 0.0)

    # pure VPU add into the resident (1, 1, TL) output block
    out_ref[...] += (w * ce)[None]


def mask_weighted_cross_entropy_loss(predict, target, mask,
                                     inmask_weight=5, outmask_weight=1,
                                     tile_pixels=512):
    """predict: (N, C, H, W) float, target: (N, H, W) int, mask: (N, H, W) int."""
    n, c, h, w = predict.shape
    hw = h * w

    # free reshapes only — no transpose, no pad, no extra HBM traffic
    logits = predict.reshape(n, c, hw)
    tgt = target.reshape(n, 1, hw).astype(jnp.int32)
    msk = mask.reshape(n, 1, hw).astype(jnp.int32)

    # pixel-tile: multiple of 128 lanes, capped so double-buffered blocks stay
    # well inside the default scoped VMEM of every generation
    # (16 MiB v5e / 32 MiB v6e / 32-of-64 MiB v7x).
    vmem_budget = 12 * 1024 * 1024
    per_pixel_bytes = 2 * (c * predict.dtype.itemsize) + 2 * (2 * 4) + 4
    tl_cap = max(128, (vmem_budget // per_pixel_bytes) // 128 * 128)
    if hw % 128 == 0:
        tl = min(max(128, ((tile_pixels + 127) // 128) * 128), tl_cap, hw)
    else:
        tl = hw  # block extent == full array dim (allowed even if not %128)
    grid = (n, pl.cdiv(hw, tl))

    kernel = functools.partial(
        _mwce_kernel, hw=hw, tl=tl,
        inmask_weight=float(inmask_weight),
        outmask_weight=float(outmask_weight))

    partials = pl.pallas_call(
        kernel,
        out_shape=jax.ShapeDtypeStruct((n, 1, tl), jnp.float32),
        grid=grid,
        in_specs=[
            pl.BlockSpec((1, c, tl), lambda i, j: (i, 0, j)),   # logits
            pl.BlockSpec((1, 1, tl), lambda i, j: (i, 0, j)),   # target
            pl.BlockSpec((1, 1, tl), lambda i, j: (i, 0, j)),   # mask
        ],
        out_specs=pl.BlockSpec((1, 1, tl), lambda i, j: (i, 0, 0)),
        compiler_params=pltpu.CompilerParams(
            dimension_semantics=("parallel", "arbitrary")),
    )(logits, tgt, msk)

    # tiny XLA epilogue: sum the per-image, per-lane partials and normalize
    return jnp.sum(partials) / jnp.float32(n * hw)


def _reference(predict, target, mask, inmask_weight=5, outmask_weight=1):
    n, c, h, w = predict.shape
    logits = jnp.transpose(predict, (0, 2, 3, 1)).reshape(-1, c).astype(jnp.float32)
    tgt = target.reshape(-1)
    msk = mask.reshape(-1)
    lse = jax.nn.logsumexp(logits, axis=-1)
    tlg = jnp.take_along_axis(logits, tgt[:, None], axis=-1)[:, 0]
    ce = lse - tlg
    wgt = jnp.where(msk != 0, float(inmask_weight), float(outmask_weight))
    return jnp.sum(wgt * ce) / (n * h * w)


if __name__ == "__main__":
    key = jax.random.PRNGKey(0)
    k1, k2, k3 = jax.random.split(key, 3)

    N, C, H, W = 2, 4, 16, 16
    predict = jax.random.normal(k1, (N, C, H, W), dtype=jnp.float32)
    target = jax.random.randint(k2, (N, H, W), 0, C, dtype=jnp.int32)
    mask = jax.random.randint(k3, (N, H, W), 0, 2, dtype=jnp.int32)

    loss = mask_weighted_cross_entropy_loss(predict, target, mask,
                                            inmask_weight=5, outmask_weight=1)
    loss = jax.block_until_ready(loss)

    ref = _reference(predict, target, mask, 5, 1)
    assert jnp.allclose(loss, ref, rtol=1e-5, atol=1e-5), (float(loss), float(ref))

    print("KERNEL_OK")
</pallas_src>

<mosaic_0001>
module attributes {stable_mosaic.version = 11 : i64} {
  func.func @_mwce_kernel(%arg0: i32, %arg1: i32, %arg2: memref<1x4x256xf32, #tpu.memory_space<vmem>>, %arg3: memref<1x1x256xi32, #tpu.memory_space<vmem>>, %arg4: memref<1x1x256xi32, #tpu.memory_space<vmem>>, %arg5: memref<1x1x256xf32, #tpu.memory_space<vmem>>) attributes {dimension_semantics = [#tpu.dimension_semantics<parallel>, #tpu.dimension_semantics<arbitrary>], iteration_bounds = array<i64: 2, 1>, scalar_prefetch = 0 : i64, scratch_operands = 0 : i64, tpu.core_type = #tpu.core_type<tc>, window_params = [{transform_indices = @transform_0, window_bounds = array<i64: 1, 4, 256>}, {transform_indices = @transform_1, window_bounds = array<i64: 1, 1, 256>}, {transform_indices = @transform_2, window_bounds = array<i64: 1, 1, 256>}, {transform_indices = @transform_3, window_bounds = array<i64: 1, 1, 256>}]} {
    %c0_i32 = arith.constant 0 : i32
    %0 = arith.cmpi eq, %arg1, %c0_i32 : i32
    %1 = arith.extui %0 : i1 to i32
    %c0_i32_0 = arith.constant 0 : i32
    %2 = arith.cmpi ne, %1, %c0_i32_0 : i32
    scf.if %2 {
      %cst_24 = arith.constant 0.000000e+00 : f32
      %48 = vector.broadcast %cst_24 : f32 to vector<1x1x256xf32>
      %c0_25 = arith.constant 0 : index
      %c0_26 = arith.constant 0 : index
      %c0_27 = arith.constant 0 : index
      %49 = vector.load %arg5[%c0_25, %c0_26, %c0_27] : memref<1x1x256xf32, #tpu.memory_space<vmem>>, vector<1x1x256xf32>
      tpu.vector_store %arg5[%c0_25, %c0_26, %c0_27], %48 {strides = array<i32>} : memref<1x1x256xf32, #tpu.memory_space<vmem>>, vector<1x1x256xf32>,
    } else {
    }
    %c0 = arith.constant 0 : index
    %c0_1 = arith.constant 0 : index
    %c0_2 = arith.constant 0 : index
    %3 = vector.load %arg2[%c0, %c0_1, %c0_2] : memref<1x4x256xf32, #tpu.memory_space<vmem>>, vector<1x4x256xf32>
    %4 = vector.shape_cast %3 : vector<1x4x256xf32> to vector<4x256xf32>
    %c0_3 = arith.constant 0 : index
    %c0_4 = arith.constant 0 : index
    %c0_5 = arith.constant 0 : index
    %5 = vector.load %arg3[%c0_3, %c0_4, %c0_5] : memref<1x1x256xi32, #tpu.memory_space<vmem>>, vector<1x1x256xi32>
    %6 = vector.shape_cast %5 : vector<1x1x256xi32> to vector<1x256xi32>
    %c0_6 = arith.constant 0 : index
    %c0_7 = arith.constant 0 : index
    %c0_8 = arith.constant 0 : index
    %7 = vector.load %arg4[%c0_6, %c0_7, %c0_8] : memref<1x1x256xi32, #tpu.memory_space<vmem>>, vector<1x1x256xi32>
    %8 = vector.shape_cast %7 : vector<1x1x256xi32> to vector<1x256xi32>
    %c256_i32 = arith.constant 256 : i32
    %9 = arith.muli %arg1, %c256_i32 : i32
    %10 = tpu.iota {dimensions = array<i32: 1>} : vector<1x256xi32>
    %11 = vector.broadcast %9 : i32 to vector<1x256xi32>
    %12 = arith.addi %11, %10 : vector<1x256xi32>
    %c256_i32_9 = arith.constant 256 : i32
    %13 = vector.broadcast %c256_i32_9 : i32 to vector<1x256xi32>
    %14 = arith.cmpi slt, %12, %13 : vector<1x256xi32>
    %cst = arith.constant 0.000000e+00 : f32
    %15 = vector.shape_cast %14 : vector<1x256xi1> to vector<1x256xi1>
    %16 = vector.broadcast %15 : vector<1x256xi1> to vector<4x256xi1>
    %17 = vector.broadcast %cst : f32 to vector<4x256xf32>
    %18 = arith.select %16, %4, %17 : vector<4x256xi1>, vector<4x256xf32>
    %cst_10 = arith.constant dense<0xFF800000> : vector<256xf32>
    %19 = vector.multi_reduction <maximumf>, %18, %cst_10 [0] : vector<4x256xf32> to vector<256xf32>
    %20 = vector.shape_cast %19 : vector<256xf32> to vector<1x256xf32>
    %21 = vector.broadcast %20 : vector<1x256xf32> to vector<4x256xf32>
    %22 = arith.subf %18, %21 : vector<4x256xf32>
    %23 = math.exp %22 : vector<4x256xf32>
    %cst_11 = arith.constant dense<0.000000e+00> : vector<256xf32>
    %24 = vector.multi_reduction <add>, %23, %cst_11 [0] : vector<4x256xf32> to vector<256xf32>
    %25 = vector.shape_cast %24 : vector<256xf32> to vector<1x256xf32>
    %26 = math.log %25 : vector<1x256xf32>
    %27 = arith.addf %20, %26 : vector<1x256xf32>
    %28 = tpu.iota {dimensions = array<i32: 0>} : vector<4x256xi32>
    %29 = vector.broadcast %6 : vector<1x256xi32> to vector<4x256xi32>
    %30 = arith.cmpi eq, %28, %29 : vector<4x256xi32>
    %cst_12 = arith.constant 0.000000e+00 : f32
    %31 = vector.broadcast %cst_12 : f32 to vector<4x256xf32>
    %32 = arith.select %30, %18, %31 : vector<4x256xi1>, vector<4x256xf32>
    %cst_13 = arith.constant dense<0.000000e+00> : vector<256xf32>
    %33 = vector.multi_reduction <add>, %32, %cst_13 [0] : vector<4x256xf32> to vector<256xf32>
    %34 = vector.shape_cast %33 : vector<256xf32> to vector<1x256xf32>
    %35 = arith.subf %27, %34 : vector<1x256xf32>
    %c0_i32_14 = arith.constant 0 : i32
    %36 = vector.broadcast %c0_i32_14 : i32 to vector<1x256xi32>
    %37 = arith.cmpi ne, %8, %36 : vector<1x256xi32>
    %cst_15 = arith.constant 5.000000e+00 : f32
    %cst_16 = arith.constant 1.000000e+00 : f32
    %38 = vector.broadcast %cst_15 : f32 to vector<1x256xf32>
    %39 = vector.broadcast %cst_16 : f32 to vector<1x256xf32>
    %40 = arith.select %37, %38, %39 : vector<1x256xi1>, vector<1x256xf32>
    %cst_17 = arith.constant 0.000000e+00 : f32
    %41 = vector.broadcast %cst_17 : f32 to vector<1x256xf32>
    %42 = arith.select %14, %40, %41 : vector<1x256xi1>, vector<1x256xf32>
    %c0_18 = arith.constant 0 : index
    %c0_19 = arith.constant 0 : index
    %c0_20 = arith.constant 0 : index
    %43 = vector.load %arg5[%c0_18, %c0_19, %c0_20] : memref<1x1x256xf32, #tpu.memory_space<vmem>>, vector<1x1x256xf32>
    %44 = arith.mulf %42, %35 : vector<1x256xf32>
    %45 = vector.shape_cast %44 : vector<1x256xf32> to vector<1x1x256xf32>
    %46 = arith.addf %43, %45 : vector<1x1x256xf32>
    %c0_21 = arith.constant 0 : index
    %c0_22 = arith.constant 0 : index
    %c0_23 = arith.constant 0 : index
    %47 = vector.load %arg5[%c0_21, %c0_22, %c0_23] : memref<1x1x256xf32, #tpu.memory_space<vmem>>, vector<1x1x256xf32>
    tpu.vector_store %arg5[%c0_21, %c0_22, %c0_23], %46 {strides = array<i32>} : memref<1x1x256xf32, #tpu.memory_space<vmem>>, vector<1x1x256xf32>,
    return
  }
  func.func @transform_0(%arg0: i32, %arg1: i32) -> (i32, i32, i32) {
    %c0_i32 = arith.constant 0 : i32
    %c0_i32_0 = arith.constant 0 : i32
    return %arg0, %c0_i32, %arg1 : i32, i32, i32
  }
  func.func @transform_1(%arg0: i32, %arg1: i32) -> (i32, i32, i32) {
    %c0_i32 = arith.constant 0 : i32
    %c0_i32_0 = arith.constant 0 : i32
    return %arg0, %c0_i32, %arg1 : i32, i32, i32
  }
  func.func @transform_2(%arg0: i32, %arg1: i32) -> (i32, i32, i32) {
    %c0_i32 = arith.constant 0 : i32
    %c0_i32_0 = arith.constant 0 : i32
    return %arg0, %c0_i32, %arg1 : i32, i32, i32
  }
  func.func @transform_3(%arg0: i32, %arg1: i32) -> (i32, i32, i32) {
    %c0_i32 = arith.constant 0 : i32
    %c0_i32_0 = arith.constant 0 : i32
    %c0_i32_1 = arith.constant 0 : i32
    return %arg0, %c0_i32, %c0_i32_0 : i32, i32, i32
  }
}

</mosaic_0001>

<bundles_post_ra>
// kernel: tpu_custom_call.1
= control target key start
LH: loop header
LB: loop body
LE: loop exit
PB: predicated region body
PF: predicated region fallthrough
CT: control target
= control target key end

     0   :  { %s1039_s0 = inlined_call_operand.hbm [shape: f32[2,4,256], index: 0, kind: input, shape index: {}]   ;;  %s1040_s1 = inlined_call_operand.hbm [shape: s32[2,1,256], index: 1, kind: input, shape index: {}]   ;;  %s1041_s2 = inlined_call_operand.hbm [shape: s32[2,1,256], index: 2, kind: input, shape index: {}]   ;;  %s1042_s3 = inlined_call_operand.hbm [shape: f32[2,1,256], index: 3, kind: output, shape index: {}]  }
   0x1   :  { %1044 = sst [smem:[#allocation14_spill]] %s1040_s1 }
   0x2   :  { %8 = vsyncpa [#allocation3], 0 }
   0x3   :  { %10 = vsyncpa [#allocation3 + $0x1], 0 }
   0x4   :  { %11 = vsyncpa [#allocation6], 0 }
   0x5   :  { %13 = vsyncpa [#allocation6 + $0x1], 0 }
   0x6   :  { %14 = vsyncpa [#allocation4], 0 }
   0x7   :  { %16 = vsyncpa [#allocation4 + $0x1], 0  ;;  %s860_s12 = smov 0   ;;  %s862_s13 = smov 0  }
   0x8   :  { %s864_s14 = smov 0   ;;  %s866_s15 = smov 0  }
   0x9   :  { %s868_s16 = smov 0   ;;  %s870_s17 = smov 0  }
   0xa LB: > { %s891_s18 = sadd.s32 4294967295, %s836_s17   ;;  %s558_s19 = sadd.s32 4294967294, %s836_s17   ;;  %s836_s17 = sphi %s870_s17, %s22_s17   ;;  %s832_s16 = sphi %s868_s16, %s1062_s16   ;;  %s828_s15 = sphi %s866_s15, %s1061_s15   ;;  %s824_s14 = sphi %s864_s14, %s1060_s14   ;;  %s820_s13 = sphi %s862_s13, %s1059_s13   ;;  %s816_s12 = sphi %s860_s12, %s1058_s12  }
   0xb   : > { %s34_s20 = sadd.s32 1, %s832_s16  ;;  %s43_s21 = sadd.s32 1, %s824_s14 }
   0xc   : > { %p36_p0 = scmp.ge.s32.totalorder %s34_s20, 2  ;;  %p50_p1 = scmp.ne.s32.totalorder %s824_s14, %s820_s13 }
   0xd   : > { %p51_p2 = scmp.eq.s32.totalorder %s836_s17, 0  ;;  %p56_p3 = scmp.ne.s32.totalorder %s820_s13, %s816_s12 }
   0xe   : > { %s1064_s20 = smov (%p36_p0, %s34_s20), 0  ;;  %p57_p5 = scmp.eq.s32.totalorder %s891_s18, 0 }
   0xf   : > { %1045 = sst [smem:[#allocation12_spill]] %s1064_s20  ;;  %p903_p4 = por %p51_p2, %p50_p1 }
  0x10   : > { %s38_s23 = ssub.s32 %s832_s16, %s1064_s20  ;;  %p136_p6 = scmp.eq.s32.totalorder %s891_s18, 1 }
  0x11   : > { %p41_p7 = scmp.eq.s32.totalorder %s38_s23, 0  ;;  %p911_p8 = por %p57_p5, %p56_p3 }
  0x12   : > { %p915_p9 = por %p136_p6, %p50_p1  ;;  %p142_p10 = scmp.eq.s32.totalorder %s558_s19, 1 }
  0x13   : > { %s920_s26 = scalar_select %p41_p7, %s824_s14, %s43_s21  }
  0x14   : > { %p922_p11 = por %p142_p10, %p56_p3  ;;  %p560_p12 = scmp.ge.s32.totalorder %s836_s17, 2 }
  0x15   : > { %1049 = sst [smem:[#allocation13_spill]] %s920_s26  ;;  %p600_p13 = scmp.lt.s32.totalorder %s836_s17, 2 }
  0x16   : > { %s162_s28 = sand.u32 1, %s824_s14   ;;  %s184_s29 = sand.u32 1, %s836_s17  }
  0x17   : > { %s564_s30 = sshll.u32 %s162_s28, 1  ;;  %p932_p0 = pnand %p600_p13, %p903_p4 }
  0x18   : > { %s565_s5 = sshll.u32 %s832_s16, 1  ;;  %s1052_s1 = sld [smem:[#allocation14_spill]] }
  0x19   : > { %s188_s10 = scalar_lea.vmem [#allocation5], %s564_s30  ;;  %s185_s19 = scalar_lea.sflag [#allocation6], %s184_s29 }
  0x1a   : > { %s198_s11 = sshll.u32 %s188_s10, 4  ;;  %s215_s23 = scalar_lea.hbm %s1041_s2, %s565_s5  ;;  %s199_s11 = int_to_ptr.vmem [resolvable:$true] %s198_s11 }
  0x1b   : > { %p568_p1 = scmp.ge.s32.totalorder %s836_s17, 1  ;;  %p224_p2 = scmp.lt.s32.totalorder %s836_s17, 3 }
  0x1c   : > { %s561_s6 = sshll.u32 %s162_s28, 3  ;;  %s577_s7 = sshll.u32 %s832_s16, 3 }
  0x1d   : > { %p947_p3 = pnand %p568_p1, %p224_p2  ;;  %s166_s26 = scalar_lea.vmem [#allocation2], %s561_s6 }
  0x1e   : > { %s194_s8 = scalar_lea.hbm %s1052_s1, %s565_s5  ;;  %s173_s1 = scalar_lea.hbm %s1039_s0, %s577_s7 }
  0x1f   : > { %s196_s9 = sshll.u32 %s194_s8, 4  ;;  %s175_s29 = sshll.u32 %s173_s1, 4  ;;  %s197_s9 = int_to_ptr.hbm [resolvable:$true] %s196_s9  ;;  %s176_s29 = int_to_ptr.hbm [resolvable:$true] %s175_s29 }
  0x20   : > { %592 = dma.hbm_to_vmem [thread:$0]  (!%p932_p0), %s197_s9, 32, %s199_s11, %s185_s19  }
  0x21   : > { %s177_s9 = sshll.u32 %s166_s26, 4  ;;  %s163_s11 = scalar_lea.sflag [#allocation3], %s162_s28  ;;  %s178_s9 = int_to_ptr.vmem [resolvable:$true] %s177_s9 }
  0x22   : > { %589 = dma.hbm_to_vmem [thread:$0]  (!%p932_p0), %s176_s29, 128, %s178_s9, %s163_s11  }
  0x23   : > { %s217_s5 = sshll.u32 %s215_s23, 4  ;;  %s209_s21 = scalar_lea.vmem [#allocation7], %s564_s30  ;;  %s218_s5 = int_to_ptr.hbm [resolvable:$true] %s217_s5 }
  0x24   : > { %s219_s22 = sshll.u32 %s209_s21, 4  ;;  %228 = sbr.rel (%p947_p3) target bundleno = 115 (0x73), region = 32  ;;  %s220_s22 = int_to_ptr.vmem [resolvable:$true] %s219_s22 }
  0x25   : > { %595 = dma.hbm_to_vmem [thread:$0]  (!%p932_p0), %s218_s5, 32, %s220_s22, %s185_s19  }
  0x26   : > { %s962_s1 = sand.u32 (!%p947_p3), 1, %s820_s13  }
  0x27   : > { %s569_s26 = sshll.u32 (!%p947_p3), %s962_s1, 3  ;;  %s231_s28 = scalar_lea.sflag (!%p947_p3), [#allocation3], %s962_s1 }
  0x28   : > { %s234_s6 = scalar_lea.vmem (!%p947_p3), [#allocation2], %s569_s26 }
  0x29   : > { %803 = dma.done.wait (%p911_p8), %s231_s28, 128  }
  0x2a   : > { %805 = vsyncadd (%p911_p8), %s231_s28, 4294967168  ;;  %s240_s30 = sand.u32 1, %s891_s18   ;;  %s972_s20 = sshll.u32 %s962_s1, 1 }
  0x2b   : > { %s241_s4 = scalar_lea.sflag [#allocation6], %s240_s30  ;;  %s244_s19 = scalar_lea.vmem [#allocation5], %s972_s20 }
  0x2c   : > { %807 = dma.done.wait (%p911_p8), %s241_s4, 64  }
  0x2d   : > { %809 = vsyncadd (%p911_p8), %s241_s4, 4294967232  ;;  %v295_v0 = vlaneseq  ;;  %s984_s23 = scalar_lea.vmem [#allocation8], %s972_s20  ;;  %v838_v2 = vmov 0.0   ;;  %v300_v3 = vld [vmem:[%s234_s6] sm:$0xff]  ;;  %vm324_vm1 = vcmask 1043456   ;;  %s254_s18 = scalar_lea.vmem [#allocation7], %s972_s20 }
  0x2e   : > { %317 = vst [vmem:[#allocation1] ss:$2 sm:$0xff] %v300_v3  ;;  %v301_v18 = vld [vmem:[%s244_s19] sm:$0x3]  ;;  %v302_v54 = vld [vmem:[%s254_s18] sm:$0x3] }
  0x2f   : > { %vm979_vm0 = vcmp.lt.s32.totalorder %v295_v0, 256  ;;  %v366_v23 = vshrl.u32 %v295_v0, 7  ;;  %v367_v24 = vperm.slane %v301_v18, 0  ;;  %v368_v25 = vperm.slane %v301_v18, 1  ;;  %s574_s24 = sshll.u32 %s828_s15, 1  ;;  %s426_s29 = sshll.u32 %s984_s23, 4  ;;  %s427_s29 = int_to_ptr.vmem [resolvable:$true] %s426_s29 }
  0x30   : > { %299 = vst.msk [vmem:[%s984_s23] sm:$0x3] %vm979_vm0, %v838_v2  ;;  %vm389_vm4 = vcmp.ne.s32.totalorder %v302_v54, 0  ;;  %v839_v62 = vmov 1.0   ;;  %s424_s10 = scalar_lea.hbm %s1042_s3, %s574_s24  ;;  %vm404_vm5 = vcmask 1040384   ;;  %s414_s15 = scalar_lea.sflag [#allocation4], %s962_s1 }
  0x31   : > { %vm369_vm2 = vcmp.eq.s32.totalorder %v366_v23, %v367_v24  ;;  %vm370_vm3 = vcmp.eq.s32.totalorder %v366_v23, %v368_v25  ;;  %v390_v63 = vsel %vm389_vm4, 5.0, %v839_v62  ;;  %s428_s9 = sshll.u32 %s424_s10, 4  ;;  %s770_s26 = scalar_lea.hbm %s1042_s3, 4  ;;  %s429_s9 = int_to_ptr.hbm [resolvable:$true] %s428_s9 }
  0x32   : > { %s764_s11 = sshra.s32 %s429_s9, 4  ;;  %s765_s11 = int_to_ptr.hbm [resolvable:$true] %s764_s11 }
  0x33   : > { %s766_s5 = scalar_lea.hbm %s765_s11, 2  ;;  %p771_p7 = scmp.lt.s32.totalorder %s765_s11, %s1042_s3 }
  0x34   : > { %p767_p4 = scmp.ne.s32.totalorder %s765_s11, %s766_s5  ;;  %p772_p8 = scmp.lt.s32.totalorder %s770_s26, %s766_s5 }
  0x35   : > { %v318_v4 = vld.sshfl [vmem:[#allocation1] sm:$0xff pattern:$0x75316420]  ;;  %v319_v5 = vld.sshfl [vmem:[#allocation1 + $0x8] sm:$0xff pattern:$0x75316420] }
  0x36   : > { %v325_v6 = vsel %vm324_vm1, %v318_v4, -inf  ;;  %v332_v7 = vsel %vm324_vm1, %v319_v5, -inf  ;;  %v371_v28 = vsel %vm369_vm2, %v318_v4, 0.0  ;;  %v372_v29 = vsel %vm370_vm3, %v319_v5, 0.0  ;;  %p768_p5 = pnand %p767_p4, %p915_p9  ;;  %p773_p10 = por %p772_p8, %p771_p7 }
  0x37   : > { %v326_v8 = vrot.slane %v325_v6, 4  ;;  %v333_v9 = vrot.slane %v332_v7, 4  ;;  %v373_v33 = vsel %vm324_vm1, %v371_v28, 0.0  ;;  %v380_v34 = vsel %vm324_vm1, %v372_v29, 0.0 }
  0x38   : > { %v374_v39 = vrot.slane %v373_v33, 4  ;;  %v381_v40 = vrot.slane %v380_v34, 4  ;;  %p769_p6 = pneg %p768_p5 }
  0x39   : > { %v327_v10 = vmax.f32 %v325_v6, %v326_v8  ;;  %v334_v11 = vmax.f32 %v332_v7, %v333_v9  ;;  %v393_v6 = vperm.slane %v390_v63, 1  ;;  %v392_v9 = vperm.slane %v390_v63, 0 }
  0x3a   : > { %v375_v45 = vadd.f32 %v374_v39, %v373_v33  ;;  %v382_v46 = vadd.f32 %v381_v40, %v380_v34  ;;  %p774_p13 = pnand %p773_p10, %p769_p6 }
  0x3b   : > { %v328_v12 = vrot.slane %v327_v10, 2  ;;  %v335_v13 = vrot.slane %v334_v11, 2 }
  0x3c   : > { %v376_v51 = vrot.slane %v375_v45, 2  ;;  %v383_v52 = vrot.slane %v382_v46, 2 }
  0x3d   : > { %v329_v14 = vmax.f32 %v327_v10, %v328_v12  ;;  %v336_v15 = vmax.f32 %v334_v11, %v335_v13  ;;  %v398_v11 = vld [vmem:[%s984_s23] sm:$0x3] }
  0x3e   : > { %v377_v55 = vadd.f32 %v376_v51, %v375_v45  ;;  %v384_v56 = vadd.f32 %v383_v52, %v382_v46 }
  0x3f   : > { %v330_v16 = vrot.slane %v329_v14, 1  ;;  %v337_v17 = vrot.slane %v336_v15, 1 }
  0x40   : > { %v378_v58 = vrot.slane %v377_v55, 1  ;;  %v385_v59 = vrot.slane %v384_v56, 1 }
  0x41   : > { %v331_v19 = vmax.f32 %v329_v14, %v330_v16  ;;  %v338_v20 = vmax.f32 %v336_v15, %v337_v17 }
  0x43   : > { %v339_v21 = vsub.f32 %v318_v4, %v331_v19  ;;  %v340_v22 = vsub.f32 %v319_v5, %v338_v20  ;;  %v379_v4 = vadd.f32 %v378_v58, %v377_v55  ;;  %v386_v5 = vadd.f32 %v385_v59, %v384_v56 }
  0x45   : > { %v341_v26 = vmul.f32 1.442695, %v339_v21  ;;  %v343_v27 = vmul.f32 1.442695, %v340_v22 }
  0x47   : > { %652 = vpow2.f32 %v341_v26 }
  0x48   : > { %654 = vpow2.f32 %v343_v27 }
  0x4d   : > { %v653_v30 = vpop.eup %652 }
  0x4e   : > { %v655_v31 = vpop.eup %654  ;;  %v345_v32 = vsel %vm324_vm1, %v653_v30, 0.0 }
  0x4f   : > { %v346_v35 = vrot.slane %v345_v32, 4  ;;  %v352_v36 = vsel %vm324_vm1, %v655_v31, 0.0 }
  0x50   : > { %v353_v37 = vrot.slane %v352_v36, 4 }
  0x51   : > { %v347_v38 = vadd.f32 %v346_v35, %v345_v32 }
  0x52   : > { %v354_v41 = vadd.f32 %v353_v37, %v352_v36 }
  0x53   : > { %v348_v42 = vrot.slane %v347_v38, 2 }
  0x54   : > { %v355_v43 = vrot.slane %v354_v41, 2 }
  0x55   : > { %v349_v44 = vadd.f32 %v348_v42, %v347_v38 }
  0x56   : > { %v356_v47 = vadd.f32 %v355_v43, %v354_v41 }
  0x57   : > { %v350_v48 = vrot.slane %v349_v44, 1 }
  0x58   : > { %v357_v49 = vrot.slane %v356_v47, 1 }
  0x59   : > { %v351_v50 = vadd.f32 %v350_v48, %v349_v44 }
  0x5a   : > { %v358_v53 = vadd.f32 %v357_v49, %v356_v47 }
  0x5b   : > { %656 = vlog2.f32 %v351_v50 }
  0x5c   : > { %658 = vlog2.f32 %v358_v53 }
  0x61   : > { %v657_v57 = vpop.eup %656 }
  0x62   : > { %v659_v60 = vpop.eup %658  ;;  %v360_v61 = vmul.f32 0.6931472, %v657_v57 }
  0x63   : > { %v362_v0 = vmul.f32 0.6931472, %v659_v60 }
  0x64   : > { %v363_v2 = vadd.f32 %v360_v61, %v331_v19 }
  0x65   : > { %v364_v3 = vadd.f32 %v362_v0, %v338_v20 }
  0x66   : > { %v387_v7 = vsub.f32 %v363_v2, %v379_v4 }
  0x67   : > { %v388_v8 = vsub.f32 %v364_v3, %v386_v5 }
  0x68   : > { %v399_v12 = vmul.f32 %v392_v9, %v387_v7 }
  0x69   : > { %v400_v10 = vmul.f32 %v393_v6, %v388_v8 }
  0x6b   : > { %v403_v13 = vrot.slane %v400_v10, 7 }
  0x6d   : > { %v405_v14 = vsel %vm404_vm5, %v399_v12, %v403_v13 }
  0x6e   : > { %v407_v15 = vadd.f32 %v405_v14, %v398_v11 }
  0x70   : > { %412 = vst.msk [vmem:[%s984_s23] sm:$0x3] %vm979_vm0, %v407_v15 }
  0x71   : > { %777 = shalt.err (!%p774_p13)
}
  0x72   : > { %584 = dma.vmem_to_hbm [thread:$0]  (%p915_p9), %s427_s29, 32, %s429_s9, %s414_s15  }
  0x73 PF: > { %s440_s1 = sand.u32 1, %s816_s12   ;;  %p597_p0 = pnand %p560_p12, %p922_p11 }
  0x74   : > { %s441_s30 = scalar_lea.sflag [#allocation4], %s440_s1 }
  0x75   : > { %p598_p1 = pneg %p597_p0 }
  0x77   : > { %811 = dma.done.wait (%p598_p1), %s441_s30, 32  }
  0x78   : > { %813 = vsyncadd (%p598_p1), %s441_s30, 4294967264  ;;  %s22_s17 = sadd.s32 1, %s836_s17   ;;  %s1056_s20 = sld [smem:[#allocation13_spill]] }
  0x79   : > { %p19_p2 = scmp.ge.s32.totalorder %s22_s17, 4   ;;  %s1057_s25 = sld [smem:[#allocation12_spill]] }
  0x7a   : > { %s1058_s12 = smov %s820_s13  ;;  %s1059_s13 = smov %s824_s14 }
  0x7b   : > { %s1061_s15 = smov %s832_s16  ;;  %21 = sbr.rel (!%p19_p2) target bundleno = 10 (0xa), region = 105 }
  0x7e   : > { %s1060_s14 = smov %s1056_s20 }
  0x7f   : > { %s1062_s16 = smov %s1057_s25 }
  0x80   :  { %447 = vsyncpa [#allocation3], 1 }
  0x81   :  { %449 = vsyncpa [#allocation3 + $0x1], 1 }
  0x82   :  { %450 = vsyncpa [#allocation6], 1 }
  0x83   :  { %452 = vsyncpa [#allocation6 + $0x1], 1 }
  0x84   :  { %453 = vsyncpa [#allocation4], 1 }
  0x85   :  { %455 = vsyncpa [#allocation4 + $0x1], 1 }

</bundles_post_ra>
